<compile_context>
chip_gen: v7x
topology: tpu7x:2x2x1
jax: 0.10.0
libtpu: 0.0.40
codegen_flags: <defaults>
</compile_context>

<pallas_src>
import functools

import numpy as np
import jax
import jax.numpy as jnp
from jax.experimental import pallas as pl
from jax.experimental.pallas import tpu as pltpu


def _round_up(a, b):
    return (a + b - 1) // b * b


def _lstm_head_kernel(x_ref, wih_ref, bias_ref, whh_ref, wfc_ref, bfc_ref,
                      out_ref, p_vmem, h_sc, c_sc, *,
                      t_actual, need_time_mask, unroll_threshold=16,
                      fori_unroll=8):
    """One (batch shard, time chunk) grid step of the fused LSTM + fc head.

    x_ref:    (Tc, Bb, D)    time-major input chunk (matmul dtype)
    wih_ref:  (D, 4H)        input weight^T, gate order [i, f, o, g]
    bias_ref: (1, 4H) f32    b_ih + b_hh (permuted)
    whh_ref:  (H, 4H)        recurrent weight^T
    wfc_ref:  (H, C)         fc weight^T
    bfc_ref:  (1, C) f32     fc bias
    out_ref:  (Bb, C) f32    logits (written on the last time chunk)
    p_vmem:   (Tc, Bb, 4H) f32  scratch: projected gate pre-activations
    h_sc/c_sc:(Bb, H) f32    hidden / cell state carried across time chunks
    """
    t_idx = pl.program_id(1)
    tc, bb, d = x_ref.shape
    h_dim = whh_ref.shape[0]

    @pl.when(t_idx == 0)
    def _init():
        h_sc[...] = jnp.zeros_like(h_sc)
        c_sc[...] = jnp.zeros_like(c_sc)

    # Fused input projection for the whole chunk (bias folded in): one MXU matmul
    # amortized over Tc serial steps, written to VMEM scratch so the serial loop
    # does cheap leading-axis loads.
    xc = x_ref[...].reshape(tc * bb, d)
    p_vmem[...] = (
        jnp.dot(xc, wih_ref[...], preferred_element_type=jnp.float32)
        + bias_ref[...]
    ).reshape(tc, bb, 4 * h_dim)

    whh = whh_ref[...]  # resident; reused every step

    def step(t, carry):
        h, c = carry  # (Bb, H) f32
        gates = p_vmem[t] + jnp.dot(h.astype(whh.dtype), whh,
                                    preferred_element_type=jnp.float32)  # (Bb,4H)
        if h_dim % 128 == 0:
            # Lane-aligned: sigmoid over one contiguous 3H slab, tanh over trailing H.
            ifo = jax.nn.sigmoid(gates[:, :3 * h_dim])
            g = jnp.tanh(gates[:, 3 * h_dim:])
            i = ifo[:, 0 * h_dim:1 * h_dim]
            f = ifo[:, 1 * h_dim:2 * h_dim]
            o = ifo[:, 2 * h_dim:3 * h_dim]
        else:
            # H < 128 lanes: whole-vreg EUP + lane-iota select instead of sub-vreg
            # lane slices feeding the activations (removes per-step XLU traffic).
            lane = jax.lax.broadcasted_iota(jnp.int32, gates.shape, 1)
            act = jnp.where(lane < 3 * h_dim,
                            jax.nn.sigmoid(gates), jnp.tanh(gates))
            i = act[:, 0 * h_dim:1 * h_dim]
            f = act[:, 1 * h_dim:2 * h_dim]
            o = act[:, 2 * h_dim:3 * h_dim]
            g = act[:, 3 * h_dim:4 * h_dim]
        c_new = f * c + i * g
        h_new = o * jnp.tanh(c_new)
        if need_time_mask:
            # Time axis was padded to a multiple of the chunk: freeze the state on
            # padded steps so h/c never advance past the true sequence length.
            valid = (t_idx * tc + t) < t_actual
            h_new = jnp.where(valid, h_new, h)
            c_new = jnp.where(valid, c_new, c)
        return h_new, c_new

    h = h_sc[...]
    c = c_sc[...]
    if tc <= unroll_threshold:
        # Small chunk: full unroll, static p_vmem[t] indices, max LLO visibility.
        for t in range(tc):
            h, c = step(t, (h, c))
    else:
        # Larger chunk: bounded unroll keeps vreg pressure in check while still
        # letting the data-independent p[t+1] load co-issue ahead of the h-matmul.
        h, c = jax.lax.fori_loop(0, tc, step, (h, c), unroll=fori_unroll)

    h_sc[...] = h
    c_sc[...] = c

    @pl.when(t_idx == pl.num_programs(1) - 1)
    def _finalize():
        # Fused classifier head on the final hidden state.
        logits = jnp.dot(h.astype(wfc_ref.dtype), wfc_ref[...],
                         preferred_element_type=jnp.float32) + bfc_ref[...]
        out_ref[...] = logits.astype(out_ref.dtype)


def _vmem_limit_bytes(tc, bb, d, h, c, mm_itemsize):
    """Explicit scoped-VMEM budget for this kernel (tile-padded, with headroom)."""
    def tile(r, cc, itemsize):
        return _round_up(r, 8) * _round_up(cc, 128) * itemsize

    total = 0
    total += 2 * tc * tile(bb, d, mm_itemsize)       # x chunk (double-buffered)
    total += 2 * tile(d, 4 * h, mm_itemsize)         # W_ih^T
    total += 2 * tile(1, 4 * h, 4)                   # bias
    total += 2 * tile(h, 4 * h, mm_itemsize)         # W_hh^T
    total += 2 * tile(h, c, mm_itemsize)             # W_fc^T
    total += 2 * tile(1, c, 4)                       # b_fc
    total += 2 * tile(bb, c, 4)                      # out
    total += tc * tile(bb, 4 * h, 4)                 # projected-chunk scratch
    total += 2 * tile(bb, h, 4)                      # h, c scratch
    # 1.5x headroom for compiler-internal scratch; clamp to v7x-safe range.
    return int(min(64 << 20, max(int(total * 1.5) + (2 << 20), 32 << 20)))


def suggested_num_shards(batch_size):
    """2 batch shards only on v7x (2 TensorCores) and only when B is large enough
    to keep both cores busy; 1 on single-TC chips (v5e/v6e), where extra shards
    would serially re-run the full recurrence."""
    try:
        kind = jax.devices()[0].device_kind.lower()
    except Exception:
        return 1
    if batch_size >= 16 and any(tag in kind for tag in ("v7", "7x", "tpu7")):
        return 2
    return 1


@functools.partial(jax.jit,
                   static_argnames=("matmul_dtype", "num_shards", "time_chunk"))
def lstm_head_forward(x, w_ih, w_hh, b_ih, b_hh, w_fc, b_fc, *,
                      matmul_dtype=jnp.float32, num_shards=1, time_chunk=32):
    """x: (B, T, in_dim) f32.  Weights in PyTorch layout:
       w_ih (4H, D), w_hh (4H, H), b_ih/b_hh (4H,), w_fc (C, H), b_fc (C,).

    matmul_dtype: jnp.bfloat16 casts MXU operands only (f32 accumulation and
                  f32 gate/state math) — useful on v6e/v7x; keep f32 on v5e.
    num_shards:   batch shards = grid "parallel" axis.  1 for v5e/v6e, 2 for v7x
                  with B >= 16 (see suggested_num_shards).  Never more than 2.
    time_chunk:   max timesteps streamed/projected per grid step (VMEM bound).
    """
    B, T, D = x.shape
    H = w_hh.shape[1]
    C = w_fc.shape[0]

    # Permute PyTorch gate order [i, f, g, o] -> [i, f, o, g] so the sigmoid lanes
    # form one contiguous 3H block.
    perm = np.concatenate([np.arange(0, 2 * H),
                           np.arange(3 * H, 4 * H),
                           np.arange(2 * H, 3 * H)])
    wih_t = jnp.transpose(w_ih[perm]).astype(matmul_dtype)        # (D, 4H)
    whh_t = jnp.transpose(w_hh[perm]).astype(matmul_dtype)        # (H, 4H)
    bias = (b_ih + b_hh)[perm].reshape(1, 4 * H).astype(jnp.float32)
    wfc_t = jnp.transpose(w_fc).astype(matmul_dtype)              # (H, C)
    bfc = b_fc.reshape(1, C).astype(jnp.float32)                  # (1, C)

    # Batch: pad to dense sublanes (multiple of 8) and split into num_shards.
    num_shards = max(1, int(num_shards))
    Bb = _round_up(max(1, -(-B // num_shards)), 8)                # rows per shard
    B_pad = Bb * num_shards
    # Time: chunked grid axis; pad T up to a multiple of the chunk.
    Tc = max(1, min(T, int(time_chunk)))
    T_pad = _round_up(T, Tc)
    need_time_mask = (T_pad != T)

    x_p = x
    if B_pad != B or T_pad != T:
        x_p = jnp.pad(x, ((0, B_pad - B), (0, T_pad - T), (0, 0)))
    # Time-major so each chunk/step reads a contiguous (Bb, ...) slab.  x (D-wide)
    # is the narrow tensor — much cheaper to transpose than the 4H-wide gates.
    x_tm = jnp.transpose(x_p, (1, 0, 2)).astype(matmul_dtype)     # (T_pad, B_pad, D)

    grid = (num_shards, T_pad // Tc)   # time axis innermost ("arbitrary")
    mm_size = jnp.dtype(matmul_dtype).itemsize

    kernel = functools.partial(_lstm_head_kernel,
                               t_actual=T, need_time_mask=need_time_mask)

    out = pl.pallas_call(
        kernel,
        out_shape=jax.ShapeDtypeStruct((B_pad, C), jnp.float32),
        grid_spec=pltpu.PrefetchScalarGridSpec(
            num_scalar_prefetch=0,
            grid=grid,
            in_specs=[
                pl.BlockSpec((Tc, Bb, D), lambda b, t: (t, b, 0)),    # x chunk
                pl.BlockSpec((D, 4 * H), lambda b, t: (0, 0)),        # W_ih^T
                pl.BlockSpec((1, 4 * H), lambda b, t: (0, 0)),        # bias
                pl.BlockSpec((H, 4 * H), lambda b, t: (0, 0)),        # W_hh^T
                pl.BlockSpec((H, C), lambda b, t: (0, 0)),            # W_fc^T
                pl.BlockSpec((1, C), lambda b, t: (0, 0)),            # b_fc
            ],
            out_specs=pl.BlockSpec((Bb, C), lambda b, t: (b, 0)),
            scratch_shapes=[
                pltpu.VMEM((Tc, Bb, 4 * H), jnp.float32),   # projected gate chunk
                pltpu.VMEM((Bb, H), jnp.float32),           # h carry
                pltpu.VMEM((Bb, H), jnp.float32),           # c carry
            ],
        ),
        # Batch shards are independent -> "parallel" (v7x megacore); time chunks
        # carry h/c and accumulate into the same output block -> "arbitrary".
        compiler_params=pltpu.CompilerParams(
            dimension_semantics=("parallel", "arbitrary"),
            vmem_limit_bytes=_vmem_limit_bytes(Tc, Bb, D, H, C, mm_size),
        ),
    )(x_tm, wih_t, bias, whh_t, wfc_t, bfc)

    return out[:B]


def _reference_forward(x, w_ih, w_hh, b_ih, b_hh, w_fc, b_fc):
    """Pure-JAX reference mirroring torch.nn.LSTM(batch_first=True) + Linear."""
    B, T, D = x.shape
    H = w_hh.shape[1]
    h = jnp.zeros((B, H), jnp.float32)
    c = jnp.zeros((B, H), jnp.float32)
    for t in range(T):
        gates = x[:, t] @ w_ih.T + h @ w_hh.T + b_ih + b_hh
        i = jax.nn.sigmoid(gates[:, 0 * H:1 * H])
        f = jax.nn.sigmoid(gates[:, 1 * H:2 * H])
        g = jnp.tanh(gates[:, 2 * H:3 * H])
        o = jax.nn.sigmoid(gates[:, 3 * H:4 * H])
        c = f * c + i * g
        h = o * jnp.tanh(c)
    return h @ w_fc.T + b_fc


def _make_inputs(key, B, T, D, H, C):
    ks = jax.random.split(key, 7)
    k_init = 1.0 / float(np.sqrt(H))   # PyTorch LSTM/Linear uniform init scale
    x = jax.random.normal(ks[0], (B, T, D), jnp.float32)
    w_ih = jax.random.uniform(ks[1], (4 * H, D), jnp.float32, -k_init, k_init)
    w_hh = jax.random.uniform(ks[2], (4 * H, H), jnp.float32, -k_init, k_init)
    b_ih = jax.random.uniform(ks[3], (4 * H,), jnp.float32, -k_init, k_init)
    b_hh = jax.random.uniform(ks[4], (4 * H,), jnp.float32, -k_init, k_init)
    w_fc = jax.random.uniform(ks[5], (C, H), jnp.float32, -k_init, k_init)
    b_fc = jax.random.uniform(ks[6], (C,), jnp.float32, -k_init, k_init)
    return x, w_ih, w_hh, b_ih, b_hh, w_fc, b_fc


if __name__ == "__main__":
    D, H, C = 16, 32, 2

    # Primary small-shape test (shapes implied by the module: x is (B, T, in_dim)).
    B, T = 2, 8
    args = _make_inputs(jax.random.PRNGKey(0), B, T, D, H, C)
    ref = _reference_forward(*args)
    ns = suggested_num_shards(B)       # 1 here; 2 only on v7x with large B
    out = jax.block_until_ready(lstm_head_forward(*args, num_shards=ns))
    assert out.shape == (B, C)
    assert jnp.allclose(out, ref, rtol=1e-5, atol=1e-5), (out, ref)

    # Second config exercising batch padding, time padding + masking, multi-chunk
    # h/c carry and the bounded fori_loop path (B % 8 != 0, T % chunk != 0).
    B2, T2 = 4, 40
    args2 = _make_inputs(jax.random.PRNGKey(1), B2, T2, D, H, C)
    ref2 = _reference_forward(*args2)
    out2 = jax.block_until_ready(lstm_head_forward(*args2, time_chunk=32))
    assert out2.shape == (B2, C)
    assert jnp.allclose(out2, ref2, rtol=1e-5, atol=1e-5), (out2, ref2)

    # bf16 MXU-operand path (f32 accumulation / state math) — looser tolerance.
    out_bf16 = jax.block_until_ready(
        lstm_head_forward(*args, matmul_dtype=jnp.bfloat16, num_shards=ns))
    assert jnp.allclose(out_bf16, ref, rtol=5e-2, atol=5e-2), (out_bf16, ref)

    print("KERNEL_OK")
</pallas_src>

<mosaic_0001>
module attributes {stable_mosaic.version = 11 : i64} {
  func.func @_lstm_head_kernel(%arg0: i32, %arg1: i32, %arg2: memref<8x8x16xf32, #tpu.memory_space<vmem>>, %arg3: memref<16x128xf32, #tpu.memory_space<vmem>>, %arg4: memref<1x128xf32, #tpu.memory_space<vmem>>, %arg5: memref<32x128xf32, #tpu.memory_space<vmem>>, %arg6: memref<32x2xf32, #tpu.memory_space<vmem>>, %arg7: memref<1x2xf32, #tpu.memory_space<vmem>>, %arg8: memref<8x2xf32, #tpu.memory_space<vmem>>, %arg9: memref<8x8x128xf32, #tpu.memory_space<vmem>>, %arg10: memref<8x32xf32, #tpu.memory_space<vmem>>, %arg11: memref<8x32xf32, #tpu.memory_space<vmem>>) attributes {dimension_semantics = [#tpu.dimension_semantics<parallel>, #tpu.dimension_semantics<arbitrary>], iteration_bounds = array<i64: 1, 1>, scalar_prefetch = 0 : i64, scratch_operands = 3 : i64, tpu.core_type = #tpu.core_type<tc>, window_params = [{transform_indices = @transform_0, window_bounds = array<i64: 8, 8, 16>}, {pipeline_mode = #tpu.pipeline_mode<synchronous>, transform_indices = @transform_1, window_bounds = array<i64: 16, 128>}, {pipeline_mode = #tpu.pipeline_mode<synchronous>, transform_indices = @transform_2, window_bounds = array<i64: 1, 128>}, {pipeline_mode = #tpu.pipeline_mode<synchronous>, transform_indices = @transform_3, window_bounds = array<i64: 32, 128>}, {pipeline_mode = #tpu.pipeline_mode<synchronous>, transform_indices = @transform_4, window_bounds = array<i64: 32, 2>}, {pipeline_mode = #tpu.pipeline_mode<synchronous>, transform_indices = @transform_5, window_bounds = array<i64: 1, 2>}, {transform_indices = @transform_6, window_bounds = array<i64: 8, 2>}]} {
    %c0_i32 = arith.constant 0 : i32
    %0 = arith.cmpi eq, %arg1, %c0_i32 : i32
    %1 = arith.extui %0 : i1 to i32
    %c0_i32_0 = arith.constant 0 : i32
    %2 = arith.cmpi ne, %1, %c0_i32_0 : i32
    scf.if %2 {
      %cst_62 = arith.constant 0.000000e+00 : f32
      %204 = vector.broadcast %cst_62 : f32 to vector<8x32xf32>
      %c0_63 = arith.constant 0 : index
      %c0_64 = arith.constant 0 : index
      %205 = vector.load %arg10[%c0_63, %c0_64] : memref<8x32xf32, #tpu.memory_space<vmem>>, vector<8x32xf32>
      tpu.vector_store %arg10[%c0_63, %c0_64], %204 {strides = array<i32>} : memref<8x32xf32, #tpu.memory_space<vmem>>, vector<8x32xf32>,
      %cst_65 = arith.constant 0.000000e+00 : f32
      %206 = vector.broadcast %cst_65 : f32 to vector<8x32xf32>
      %c0_66 = arith.constant 0 : index
      %c0_67 = arith.constant 0 : index
      %207 = vector.load %arg11[%c0_66, %c0_67] : memref<8x32xf32, #tpu.memory_space<vmem>>, vector<8x32xf32>
      tpu.vector_store %arg11[%c0_66, %c0_67], %206 {strides = array<i32>} : memref<8x32xf32, #tpu.memory_space<vmem>>, vector<8x32xf32>,
    } else {
    }
    %c0 = arith.constant 0 : index
    %c0_1 = arith.constant 0 : index
    %c0_2 = arith.constant 0 : index
    %3 = vector.load %arg2[%c0, %c0_1, %c0_2] : memref<8x8x16xf32, #tpu.memory_space<vmem>>, vector<8x8x16xf32>
    %4 = vector.shape_cast %3 : vector<8x8x16xf32> to vector<64x16xf32>
    %c0_3 = arith.constant 0 : index
    %c0_4 = arith.constant 0 : index
    %5 = vector.load %arg3[%c0_3, %c0_4] : memref<16x128xf32, #tpu.memory_space<vmem>>, vector<16x128xf32>
    %cst = arith.constant dense<0.000000e+00> : vector<64x128xf32>
    %6 = tpu.matmul %4, %5, %cst {dimension_numbers = #tpu.dot_dimension_numbers<[1], [0], [0], [1], [0, 0, 1, 1], [], []>} : vector<64x16xf32>, vector<16x128xf32>, vector<64x128xf32> -> vector<64x128xf32>
    %c0_5 = arith.constant 0 : index
    %c0_6 = arith.constant 0 : index
    %7 = vector.load %arg4[%c0_5, %c0_6] : memref<1x128xf32, #tpu.memory_space<vmem>>, vector<1x128xf32>
    %8 = vector.broadcast %7 : vector<1x128xf32> to vector<64x128xf32>
    %9 = arith.addf %6, %8 : vector<64x128xf32>
    %10 = vector.shape_cast %9 : vector<64x128xf32> to vector<8x8x128xf32>
    %c0_7 = arith.constant 0 : index
    %c0_8 = arith.constant 0 : index
    %c0_9 = arith.constant 0 : index
    %11 = vector.load %arg9[%c0_7, %c0_8, %c0_9] : memref<8x8x128xf32, #tpu.memory_space<vmem>>, vector<8x8x128xf32>
    tpu.vector_store %arg9[%c0_7, %c0_8, %c0_9], %10 {strides = array<i32>} : memref<8x8x128xf32, #tpu.memory_space<vmem>>, vector<8x8x128xf32>,
    %c0_10 = arith.constant 0 : index
    %c0_11 = arith.constant 0 : index
    %12 = vector.load %arg5[%c0_10, %c0_11] : memref<32x128xf32, #tpu.memory_space<vmem>>, vector<32x128xf32>
    %c0_12 = arith.constant 0 : index
    %c0_13 = arith.constant 0 : index
    %13 = vector.load %arg10[%c0_12, %c0_13] : memref<8x32xf32, #tpu.memory_space<vmem>>, vector<8x32xf32>
    %c0_14 = arith.constant 0 : index
    %c0_15 = arith.constant 0 : index
    %14 = vector.load %arg11[%c0_14, %c0_15] : memref<8x32xf32, #tpu.memory_space<vmem>>, vector<8x32xf32>
    %c0_16 = arith.constant 0 : index
    %c0_17 = arith.constant 0 : index
    %c0_18 = arith.constant 0 : index
    %15 = vector.load %arg9[%c0_16, %c0_17, %c0_18] : memref<8x8x128xf32, #tpu.memory_space<vmem>>, vector<1x8x128xf32>
    %16 = vector.shape_cast %15 : vector<1x8x128xf32> to vector<8x128xf32>
    %cst_19 = arith.constant dense<0.000000e+00> : vector<8x128xf32>
    %17 = tpu.matmul %13, %12, %cst_19 {dimension_numbers = #tpu.dot_dimension_numbers<[1], [0], [0], [1], [0, 0, 1, 1], [], []>} : vector<8x32xf32>, vector<32x128xf32>, vector<8x128xf32> -> vector<8x128xf32>
    %18 = arith.addf %16, %17 : vector<8x128xf32>
    %19 = tpu.iota {dimensions = array<i32: 1>} : vector<8x128xi32>
    %c96_i32 = arith.constant 96 : i32
    %20 = vector.broadcast %c96_i32 : i32 to vector<8x128xi32>
    %21 = arith.cmpi slt, %19, %20 : vector<8x128xi32>
    %22 = arith.negf %18 : vector<8x128xf32>
    %23 = math.exp %22 : vector<8x128xf32>
    %cst_20 = arith.constant 1.000000e+00 : f32
    %24 = vector.broadcast %cst_20 : f32 to vector<8x128xf32>
    %25 = arith.addf %24, %23 : vector<8x128xf32>
    %26 = arith.divf %24, %25 : vector<8x128xf32>
    %27 = math.tanh %18 : vector<8x128xf32>
    %28 = arith.select %21, %26, %27 : vector<8x128xi1>, vector<8x128xf32>
    %29 = vector.extract_strided_slice %28 {offsets = [0, 0], sizes = [8, 32], strides = [1, 1]} : vector<8x128xf32> to vector<8x32xf32>
    %30 = vector.extract_strided_slice %28 {offsets = [0, 32], sizes = [8, 32], strides = [1, 1]} : vector<8x128xf32> to vector<8x32xf32>
    %31 = vector.extract_strided_slice %28 {offsets = [0, 64], sizes = [8, 32], strides = [1, 1]} : vector<8x128xf32> to vector<8x32xf32>
    %32 = vector.extract_strided_slice %28 {offsets = [0, 96], sizes = [8, 32], strides = [1, 1]} : vector<8x128xf32> to vector<8x32xf32>
    %33 = arith.mulf %30, %14 : vector<8x32xf32>
    %34 = arith.mulf %29, %32 : vector<8x32xf32>
    %35 = arith.addf %33, %34 : vector<8x32xf32>
    %36 = math.tanh %35 : vector<8x32xf32>
    %37 = arith.mulf %31, %36 : vector<8x32xf32>
    %c1 = arith.constant 1 : index
    %c0_21 = arith.constant 0 : index
    %c0_22 = arith.constant 0 : index
    %38 = vector.load %arg9[%c1, %c0_21, %c0_22] : memref<8x8x128xf32, #tpu.memory_space<vmem>>, vector<1x8x128xf32>
    %39 = vector.shape_cast %38 : vector<1x8x128xf32> to vector<8x128xf32>
    %cst_23 = arith.constant dense<0.000000e+00> : vector<8x128xf32>
    %40 = tpu.matmul %37, %12, %cst_23 {dimension_numbers = #tpu.dot_dimension_numbers<[1], [0], [0], [1], [0, 0, 1, 1], [], []>} : vector<8x32xf32>, vector<32x128xf32>, vector<8x128xf32> -> vector<8x128xf32>
    %41 = arith.addf %39, %40 : vector<8x128xf32>
    %42 = tpu.iota {dimensions = array<i32: 1>} : vector<8x128xi32>
    %c96_i32_24 = arith.constant 96 : i32
    %43 = vector.broadcast %c96_i32_24 : i32 to vector<8x128xi32>
    %44 = arith.cmpi slt, %42, %43 : vector<8x128xi32>
    %45 = arith.negf %41 : vector<8x128xf32>
    %46 = math.exp %45 : vector<8x128xf32>
    %cst_25 = arith.constant 1.000000e+00 : f32
    %47 = vector.broadcast %cst_25 : f32 to vector<8x128xf32>
    %48 = arith.addf %47, %46 : vector<8x128xf32>
    %49 = arith.divf %47, %48 : vector<8x128xf32>
    %50 = math.tanh %41 : vector<8x128xf32>
    %51 = arith.select %44, %49, %50 : vector<8x128xi1>, vector<8x128xf32>
    %52 = vector.extract_strided_slice %51 {offsets = [0, 0], sizes = [8, 32], strides = [1, 1]} : vector<8x128xf32> to vector<8x32xf32>
    %53 = vector.extract_strided_slice %51 {offsets = [0, 32], sizes = [8, 32], strides = [1, 1]} : vector<8x128xf32> to vector<8x32xf32>
    %54 = vector.extract_strided_slice %51 {offsets = [0, 64], sizes = [8, 32], strides = [1, 1]} : vector<8x128xf32> to vector<8x32xf32>
    %55 = vector.extract_strided_slice %51 {offsets = [0, 96], sizes = [8, 32], strides = [1, 1]} : vector<8x128xf32> to vector<8x32xf32>
    %56 = arith.mulf %53, %35 : vector<8x32xf32>
    %57 = arith.mulf %52, %55 : vector<8x32xf32>
    %58 = arith.addf %56, %57 : vector<8x32xf32>
    %59 = math.tanh %58 : vector<8x32xf32>
    %60 = arith.mulf %54, %59 : vector<8x32xf32>
    %c2 = arith.constant 2 : index
    %c0_26 = arith.constant 0 : index
    %c0_27 = arith.constant 0 : index
    %61 = vector.load %arg9[%c2, %c0_26, %c0_27] : memref<8x8x128xf32, #tpu.memory_space<vmem>>, vector<1x8x128xf32>
    %62 = vector.shape_cast %61 : vector<1x8x128xf32> to vector<8x128xf32>
    %cst_28 = arith.constant dense<0.000000e+00> : vector<8x128xf32>
    %63 = tpu.matmul %60, %12, %cst_28 {dimension_numbers = #tpu.dot_dimension_numbers<[1], [0], [0], [1], [0, 0, 1, 1], [], []>} : vector<8x32xf32>, vector<32x128xf32>, vector<8x128xf32> -> vector<8x128xf32>
    %64 = arith.addf %62, %63 : vector<8x128xf32>
    %65 = tpu.iota {dimensions = array<i32: 1>} : vector<8x128xi32>
    %c96_i32_29 = arith.constant 96 : i32
    %66 = vector.broadcast %c96_i32_29 : i32 to vector<8x128xi32>
    %67 = arith.cmpi slt, %65, %66 : vector<8x128xi32>
    %68 = arith.negf %64 : vector<8x128xf32>
    %69 = math.exp %68 : vector<8x128xf32>
    %cst_30 = arith.constant 1.000000e+00 : f32
    %70 = vector.broadcast %cst_30 : f32 to vector<8x128xf32>
    %71 = arith.addf %70, %69 : vector<8x128xf32>
    %72 = arith.divf %70, %71 : vector<8x128xf32>
    %73 = math.tanh %64 : vector<8x128xf32>
    %74 = arith.select %67, %72, %73 : vector<8x128xi1>, vector<8x128xf32>
    %75 = vector.extract_strided_slice %74 {offsets = [0, 0], sizes = [8, 32], strides = [1, 1]} : vector<8x128xf32> to vector<8x32xf32>
    %76 = vector.extract_strided_slice %74 {offsets = [0, 32], sizes = [8, 32], strides = [1, 1]} : vector<8x128xf32> to vector<8x32xf32>
    %77 = vector.extract_strided_slice %74 {offsets = [0, 64], sizes = [8, 32], strides = [1, 1]} : vector<8x128xf32> to vector<8x32xf32>
    %78 = vector.extract_strided_slice %74 {offsets = [0, 96], sizes = [8, 32], strides = [1, 1]} : vector<8x128xf32> to vector<8x32xf32>
    %79 = arith.mulf %76, %58 : vector<8x32xf32>
    %80 = arith.mulf %75, %78 : vector<8x32xf32>
    %81 = arith.addf %79, %80 : vector<8x32xf32>
    %82 = math.tanh %81 : vector<8x32xf32>
    %83 = arith.mulf %77, %82 : vector<8x32xf32>
    %c3 = arith.constant 3 : index
    %c0_31 = arith.constant 0 : index
    %c0_32 = arith.constant 0 : index
    %84 = vector.load %arg9[%c3, %c0_31, %c0_32] : memref<8x8x128xf32, #tpu.memory_space<vmem>>, vector<1x8x128xf32>
    %85 = vector.shape_cast %84 : vector<1x8x128xf32> to vector<8x128xf32>
    %cst_33 = arith.constant dense<0.000000e+00> : vector<8x128xf32>
    %86 = tpu.matmul %83, %12, %cst_33 {dimension_numbers = #tpu.dot_dimension_numbers<[1], [0], [0], [1], [0, 0, 1, 1], [], []>} : vector<8x32xf32>, vector<32x128xf32>, vector<8x128xf32> -> vector<8x128xf32>
    %87 = arith.addf %85, %86 : vector<8x128xf32>
    %88 = tpu.iota {dimensions = array<i32: 1>} : vector<8x128xi32>
    %c96_i32_34 = arith.constant 96 : i32
    %89 = vector.broadcast %c96_i32_34 : i32 to vector<8x128xi32>
    %90 = arith.cmpi slt, %88, %89 : vector<8x128xi32>
    %91 = arith.negf %87 : vector<8x128xf32>
    %92 = math.exp %91 : vector<8x128xf32>
    %cst_35 = arith.constant 1.000000e+00 : f32
    %93 = vector.broadcast %cst_35 : f32 to vector<8x128xf32>
    %94 = arith.addf %93, %92 : vector<8x128xf32>
    %95 = arith.divf %93, %94 : vector<8x128xf32>
    %96 = math.tanh %87 : vector<8x128xf32>
    %97 = arith.select %90, %95, %96 : vector<8x128xi1>, vector<8x128xf32>
    %98 = vector.extract_strided_slice %97 {offsets = [0, 0], sizes = [8, 32], strides = [1, 1]} : vector<8x128xf32> to vector<8x32xf32>
    %99 = vector.extract_strided_slice %97 {offsets = [0, 32], sizes = [8, 32], strides = [1, 1]} : vector<8x128xf32> to vector<8x32xf32>
    %100 = vector.extract_strided_slice %97 {offsets = [0, 64], sizes = [8, 32], strides = [1, 1]} : vector<8x128xf32> to vector<8x32xf32>
    %101 = vector.extract_strided_slice %97 {offsets = [0, 96], sizes = [8, 32], strides = [1, 1]} : vector<8x128xf32> to vector<8x32xf32>
    %102 = arith.mulf %99, %81 : vector<8x32xf32>
    %103 = arith.mulf %98, %101 : vector<8x32xf32>
    %104 = arith.addf %102, %103 : vector<8x32xf32>
    %105 = math.tanh %104 : vector<8x32xf32>
    %106 = arith.mulf %100, %105 : vector<8x32xf32>
    %c4 = arith.constant 4 : index
    %c0_36 = arith.constant 0 : index
    %c0_37 = arith.constant 0 : index
    %107 = vector.load %arg9[%c4, %c0_36, %c0_37] : memref<8x8x128xf32, #tpu.memory_space<vmem>>, vector<1x8x128xf32>
    %108 = vector.shape_cast %107 : vector<1x8x128xf32> to vector<8x128xf32>
    %cst_38 = arith.constant dense<0.000000e+00> : vector<8x128xf32>
    %109 = tpu.matmul %106, %12, %cst_38 {dimension_numbers = #tpu.dot_dimension_numbers<[1], [0], [0], [1], [0, 0, 1, 1], [], []>} : vector<8x32xf32>, vector<32x128xf32>, vector<8x128xf32> -> vector<8x128xf32>
    %110 = arith.addf %108, %109 : vector<8x128xf32>
    %111 = tpu.iota {dimensions = array<i32: 1>} : vector<8x128xi32>
    %c96_i32_39 = arith.constant 96 : i32
    %112 = vector.broadcast %c96_i32_39 : i32 to vector<8x128xi32>
    %113 = arith.cmpi slt, %111, %112 : vector<8x128xi32>
    %114 = arith.negf %110 : vector<8x128xf32>
    %115 = math.exp %114 : vector<8x128xf32>
    %cst_40 = arith.constant 1.000000e+00 : f32
    %116 = vector.broadcast %cst_40 : f32 to vector<8x128xf32>
    %117 = arith.addf %116, %115 : vector<8x128xf32>
    %118 = arith.divf %116, %117 : vector<8x128xf32>
    %119 = math.tanh %110 : vector<8x128xf32>
    %120 = arith.select %113, %118, %119 : vector<8x128xi1>, vector<8x128xf32>
    %121 = vector.extract_strided_slice %120 {offsets = [0, 0], sizes = [8, 32], strides = [1, 1]} : vector<8x128xf32> to vector<8x32xf32>
    %122 = vector.extract_strided_slice %120 {offsets = [0, 32], sizes = [8, 32], strides = [1, 1]} : vector<8x128xf32> to vector<8x32xf32>
    %123 = vector.extract_strided_slice %120 {offsets = [0, 64], sizes = [8, 32], strides = [1, 1]} : vector<8x128xf32> to vector<8x32xf32>
    %124 = vector.extract_strided_slice %120 {offsets = [0, 96], sizes = [8, 32], strides = [1, 1]} : vector<8x128xf32> to vector<8x32xf32>
    %125 = arith.mulf %122, %104 : vector<8x32xf32>
    %126 = arith.mulf %121, %124 : vector<8x32xf32>
    %127 = arith.addf %125, %126 : vector<8x32xf32>
    %128 = math.tanh %127 : vector<8x32xf32>
    %129 = arith.mulf %123, %128 : vector<8x32xf32>
    %c5 = arith.constant 5 : index
    %c0_41 = arith.constant 0 : index
    %c0_42 = arith.constant 0 : index
    %130 = vector.load %arg9[%c5, %c0_41, %c0_42] : memref<8x8x128xf32, #tpu.memory_space<vmem>>, vector<1x8x128xf32>
    %131 = vector.shape_cast %130 : vector<1x8x128xf32> to vector<8x128xf32>
    %cst_43 = arith.constant dense<0.000000e+00> : vector<8x128xf32>
    %132 = tpu.matmul %129, %12, %cst_43 {dimension_numbers = #tpu.dot_dimension_numbers<[1], [0], [0], [1], [0, 0, 1, 1], [], []>} : vector<8x32xf32>, vector<32x128xf32>, vector<8x128xf32> -> vector<8x128xf32>
    %133 = arith.addf %131, %132 : vector<8x128xf32>
    %134 = tpu.iota {dimensions = array<i32: 1>} : vector<8x128xi32>
    %c96_i32_44 = arith.constant 96 : i32
    %135 = vector.broadcast %c96_i32_44 : i32 to vector<8x128xi32>
    %136 = arith.cmpi slt, %134, %135 : vector<8x128xi32>
    %137 = arith.negf %133 : vector<8x128xf32>
    %138 = math.exp %137 : vector<8x128xf32>
    %cst_45 = arith.constant 1.000000e+00 : f32
    %139 = vector.broadcast %cst_45 : f32 to vector<8x128xf32>
    %140 = arith.addf %139, %138 : vector<8x128xf32>
    %141 = arith.divf %139, %140 : vector<8x128xf32>
    %142 = math.tanh %133 : vector<8x128xf32>
    %143 = arith.select %136, %141, %142 : vector<8x128xi1>, vector<8x128xf32>
    %144 = vector.extract_strided_slice %143 {offsets = [0, 0], sizes = [8, 32], strides = [1, 1]} : vector<8x128xf32> to vector<8x32xf32>
    %145 = vector.extract_strided_slice %143 {offsets = [0, 32], sizes = [8, 32], strides = [1, 1]} : vector<8x128xf32> to vector<8x32xf32>
    %146 = vector.extract_strided_slice %143 {offsets = [0, 64], sizes = [8, 32], strides = [1, 1]} : vector<8x128xf32> to vector<8x32xf32>
    %147 = vector.extract_strided_slice %143 {offsets = [0, 96], sizes = [8, 32], strides = [1, 1]} : vector<8x128xf32> to vector<8x32xf32>
    %148 = arith.mulf %145, %127 : vector<8x32xf32>
    %149 = arith.mulf %144, %147 : vector<8x32xf32>
    %150 = arith.addf %148, %149 : vector<8x32xf32>
    %151 = math.tanh %150 : vector<8x32xf32>
    %152 = arith.mulf %146, %151 : vector<8x32xf32>
    %c6 = arith.constant 6 : index
    %c0_46 = arith.constant 0 : index
    %c0_47 = arith.constant 0 : index
    %153 = vector.load %arg9[%c6, %c0_46, %c0_47] : memref<8x8x128xf32, #tpu.memory_space<vmem>>, vector<1x8x128xf32>
    %154 = vector.shape_cast %153 : vector<1x8x128xf32> to vector<8x128xf32>
    %cst_48 = arith.constant dense<0.000000e+00> : vector<8x128xf32>
    %155 = tpu.matmul %152, %12, %cst_48 {dimension_numbers = #tpu.dot_dimension_numbers<[1], [0], [0], [1], [0, 0, 1, 1], [], []>} : vector<8x32xf32>, vector<32x128xf32>, vector<8x128xf32> -> vector<8x128xf32>
    %156 = arith.addf %154, %155 : vector<8x128xf32>
    %157 = tpu.iota {dimensions = array<i32: 1>} : vector<8x128xi32>
    %c96_i32_49 = arith.constant 96 : i32
    %158 = vector.broadcast %c96_i32_49 : i32 to vector<8x128xi32>
    %159 = arith.cmpi slt, %157, %158 : vector<8x128xi32>
    %160 = arith.negf %156 : vector<8x128xf32>
    %161 = math.exp %160 : vector<8x128xf32>
    %cst_50 = arith.constant 1.000000e+00 : f32
    %162 = vector.broadcast %cst_50 : f32 to vector<8x128xf32>
    %163 = arith.addf %162, %161 : vector<8x128xf32>
    %164 = arith.divf %162, %163 : vector<8x128xf32>
    %165 = math.tanh %156 : vector<8x128xf32>
    %166 = arith.select %159, %164, %165 : vector<8x128xi1>, vector<8x128xf32>
    %167 = vector.extract_strided_slice %166 {offsets = [0, 0], sizes = [8, 32], strides = [1, 1]} : vector<8x128xf32> to vector<8x32xf32>
    %168 = vector.extract_strided_slice %166 {offsets = [0, 32], sizes = [8, 32], strides = [1, 1]} : vector<8x128xf32> to vector<8x32xf32>
    %169 = vector.extract_strided_slice %166 {offsets = [0, 64], sizes = [8, 32], strides = [1, 1]} : vector<8x128xf32> to vector<8x32xf32>
    %170 = vector.extract_strided_slice %166 {offsets = [0, 96], sizes = [8, 32], strides = [1, 1]} : vector<8x128xf32> to vector<8x32xf32>
    %171 = arith.mulf %168, %150 : vector<8x32xf32>
    %172 = arith.mulf %167, %170 : vector<8x32xf32>
    %173 = arith.addf %171, %172 : vector<8x32xf32>
    %174 = math.tanh %173 : vector<8x32xf32>
    %175 = arith.mulf %169, %174 : vector<8x32xf32>
    %c7 = arith.constant 7 : index
    %c0_51 = arith.constant 0 : index
    %c0_52 = arith.constant 0 : index
    %176 = vector.load %arg9[%c7, %c0_51, %c0_52] : memref<8x8x128xf32, #tpu.memory_space<vmem>>, vector<1x8x128xf32>
    %177 = vector.shape_cast %176 : vector<1x8x128xf32> to vector<8x128xf32>
    %cst_53 = arith.constant dense<0.000000e+00> : vector<8x128xf32>
    %178 = tpu.matmul %175, %12, %cst_53 {dimension_numbers = #tpu.dot_dimension_numbers<[1], [0], [0], [1], [0, 0, 1, 1], [], []>} : vector<8x32xf32>, vector<32x128xf32>, vector<8x128xf32> -> vector<8x128xf32>
    %179 = arith.addf %177, %178 : vector<8x128xf32>
    %180 = tpu.iota {dimensions = array<i32: 1>} : vector<8x128xi32>
    %c96_i32_54 = arith.constant 96 : i32
    %181 = vector.broadcast %c96_i32_54 : i32 to vector<8x128xi32>
    %182 = arith.cmpi slt, %180, %181 : vector<8x128xi32>
    %183 = arith.negf %179 : vector<8x128xf32>
    %184 = math.exp %183 : vector<8x128xf32>
    %cst_55 = arith.constant 1.000000e+00 : f32
    %185 = vector.broadcast %cst_55 : f32 to vector<8x128xf32>
    %186 = arith.addf %185, %184 : vector<8x128xf32>
    %187 = arith.divf %185, %186 : vector<8x128xf32>
    %188 = math.tanh %179 : vector<8x128xf32>
    %189 = arith.select %182, %187, %188 : vector<8x128xi1>, vector<8x128xf32>
    %190 = vector.extract_strided_slice %189 {offsets = [0, 0], sizes = [8, 32], strides = [1, 1]} : vector<8x128xf32> to vector<8x32xf32>
    %191 = vector.extract_strided_slice %189 {offsets = [0, 32], sizes = [8, 32], strides = [1, 1]} : vector<8x128xf32> to vector<8x32xf32>
    %192 = vector.extract_strided_slice %189 {offsets = [0, 64], sizes = [8, 32], strides = [1, 1]} : vector<8x128xf32> to vector<8x32xf32>
    %193 = vector.extract_strided_slice %189 {offsets = [0, 96], sizes = [8, 32], strides = [1, 1]} : vector<8x128xf32> to vector<8x32xf32>
    %194 = arith.mulf %191, %173 : vector<8x32xf32>
    %195 = arith.mulf %190, %193 : vector<8x32xf32>
    %196 = arith.addf %194, %195 : vector<8x32xf32>
    %197 = math.tanh %196 : vector<8x32xf32>
    %198 = arith.mulf %192, %197 : vector<8x32xf32>
    %c0_56 = arith.constant 0 : index
    %c0_57 = arith.constant 0 : index
    %199 = vector.load %arg10[%c0_56, %c0_57] : memref<8x32xf32, #tpu.memory_space<vmem>>, vector<8x32xf32>
    tpu.vector_store %arg10[%c0_56, %c0_57], %198 {strides = array<i32>} : memref<8x32xf32, #tpu.memory_space<vmem>>, vector<8x32xf32>,
    %c0_58 = arith.constant 0 : index
    %c0_59 = arith.constant 0 : index
    %200 = vector.load %arg11[%c0_58, %c0_59] : memref<8x32xf32, #tpu.memory_space<vmem>>, vector<8x32xf32>
    tpu.vector_store %arg11[%c0_58, %c0_59], %196 {strides = array<i32>} : memref<8x32xf32, #tpu.memory_space<vmem>>, vector<8x32xf32>,
    %c0_i32_60 = arith.constant 0 : i32
    %201 = arith.cmpi eq, %arg1, %c0_i32_60 : i32
    %202 = arith.extui %201 : i1 to i32
    %c0_i32_61 = arith.constant 0 : i32
    %203 = arith.cmpi ne, %202, %c0_i32_61 : i32
    scf.if %203 {
      %c0_62 = arith.constant 0 : index
      %c0_63 = arith.constant 0 : index
      %204 = vector.load %arg6[%c0_62, %c0_63] : memref<32x2xf32, #tpu.memory_space<vmem>>, vector<32x2xf32>
      %cst_64 = arith.constant dense<0.000000e+00> : vector<8x2xf32>
      %205 = tpu.matmul %198, %204, %cst_64 {dimension_numbers = #tpu.dot_dimension_numbers<[1], [0], [0], [1], [0, 0, 1, 1], [], []>} : vector<8x32xf32>, vector<32x2xf32>, vector<8x2xf32> -> vector<8x2xf32>
      %c0_65 = arith.constant 0 : index
      %c0_66 = arith.constant 0 : index
      %206 = vector.load %arg7[%c0_65, %c0_66] : memref<1x2xf32, #tpu.memory_space<vmem>>, vector<1x2xf32>
      %207 = vector.broadcast %206 : vector<1x2xf32> to vector<8x2xf32>
      %208 = arith.addf %205, %207 : vector<8x2xf32>
      %c0_67 = arith.constant 0 : index
      %c0_68 = arith.constant 0 : index
      %209 = vector.load %arg8[%c0_67, %c0_68] : memref<8x2xf32, #tpu.memory_space<vmem>>, vector<8x2xf32>
      tpu.vector_store %arg8[%c0_67, %c0_68], %208 {strides = array<i32>} : memref<8x2xf32, #tpu.memory_space<vmem>>, vector<8x2xf32>,
    } else {
    }
    return
  }
  func.func @transform_0(%arg0: i32, %arg1: i32) -> (i32, i32, i32) {
    %c0_i32 = arith.constant 0 : i32
    %c0_i32_0 = arith.constant 0 : i32
    return %arg1, %arg0, %c0_i32 : i32, i32, i32
  }
  func.func @transform_1(%arg0: i32, %arg1: i32) -> (i32, i32) {
    %c0_i32 = arith.constant 0 : i32
    %c0_i32_0 = arith.constant 0 : i32
    %c0_i32_1 = arith.constant 0 : i32
    return %c0_i32, %c0_i32_0 : i32, i32
  }
  func.func @transform_2(%arg0: i32, %arg1: i32) -> (i32, i32) {
    %c0_i32 = arith.constant 0 : i32
    %c0_i32_0 = arith.constant 0 : i32
    %c0_i32_1 = arith.constant 0 : i32
    return %c0_i32, %c0_i32_0 : i32, i32
  }
  func.func @transform_3(%arg0: i32, %arg1: i32) -> (i32, i32) {
    %c0_i32 = arith.constant 0 : i32
    %c0_i32_0 = arith.constant 0 : i32
    %c0_i32_1 = arith.constant 0 : i32
    return %c0_i32, %c0_i32_0 : i32, i32
  }
  func.func @transform_4(%arg0: i32, %arg1: i32) -> (i32, i32) {
    %c0_i32 = arith.constant 0 : i32
    %c0_i32_0 = arith.constant 0 : i32
    %c0_i32_1 = arith.constant 0 : i32
    return %c0_i32, %c0_i32_0 : i32, i32
  }
  func.func @transform_5(%arg0: i32, %arg1: i32) -> (i32, i32) {
    %c0_i32 = arith.constant 0 : i32
    %c0_i32_0 = arith.constant 0 : i32
    %c0_i32_1 = arith.constant 0 : i32
    return %c0_i32, %c0_i32_0 : i32, i32
  }
  func.func @transform_6(%arg0: i32, %arg1: i32) -> (i32, i32) {
    %c0_i32 = arith.constant 0 : i32
    %c0_i32_0 = arith.constant 0 : i32
    return %arg0, %c0_i32 : i32, i32
  }
}

</mosaic_0001>

<bundles_post_ra>
// kernel: lstm_head_forward.1
= control target key start
LH: loop header
LB: loop body
LE: loop exit
PB: predicated region body
PF: predicated region fallthrough
CT: control target
= control target key end

     0   :  { %vm47_vm0 = vcmask 130048   ;;  %v1447_v0 = vmov 0.0|0.0   ;;  %vm1448_vm1 = vmmov 0   ;;  %v1449_v4 = vmov 0.0   ;;  %s1451_s13 = smov 64   ;;  %s1452_s8 = smov 96   ;;  %s1704_s1 = inlined_call_operand.vmem [shape: f32[16,128], index: 1, kind: input, shape index: {}]   ;;  %s1705_s3 = inlined_call_operand.vmem [shape: f32[32,128], index: 3, kind: input, shape index: {}]   ;;  %s1706_s0 = inlined_call_operand.vmem [shape: f32[8,8,16], index: 0, kind: input, shape index: {}]   ;;  %s1707_s2 = inlined_call_operand.vmem [shape: f32[1,128], index: 2, kind: input, shape index: {}]   ;;  %s1708_s4 = inlined_call_operand.vmem [shape: f32[32,2], index: 4, kind: input, shape index: {}]   ;;  %s1709_s5 = inlined_call_operand.vmem [shape: f32[1,2], index: 5, kind: input, shape index: {}]   ;;  %s1710_s6 = inlined_call_operand.vmem [shape: f32[8,2], index: 6, kind: output, shape index: {}]  }
   0x1   :  { %1323 = vmatprep.subr.bf16.mxu1 %v1447_v0  ;;  %v38_v1 = vld [vmem:[%s1704_s1] sm:$0xff]  ;;  %v39_v2 = vld [vmem:[%s1704_s1 + $0x8] sm:$0xff]  ;;  %1228 = vmatprep.mubr.msk.f32.mxu1 %vm1448_vm1, %v1449_v4  ;;  %vm27_vm2 = vcmask 261120   ;;  %v187_v9 = vld [vmem:[%s1705_s3 + $0x10] sm:$0xff]  ;;  %v267_v24 = vlaneseq  ;;  %vm1116_vm4 = vcmask 15360  }
   0x2   :  { %v185_v3 = vld [vmem:[%s1705_s3] sm:$0xff]  ;;  %v1319_v5 = vpack.c.bf16 %v39_v2, %v38_v1  ;;  %v186_v6 = vld [vmem:[%s1705_s3 + $0x8] sm:$0xff]  ;;  %28 = vst.msk [vmem:[#allocation3] sm:$0xff] %vm27_vm2, %v1449_v4  ;;  %29 = vst.msk [vmem:[#allocation4] sm:$0xff] %vm27_vm2, %v1449_v4 }
   0x3   :  { %v30_v7 = vld [vmem:[%s1706_s0] sm:$0xff]  ;;  %v1510_v8 = vpack.c.bf16 %v186_v6, %v185_v3  ;;  %v188_v10 = vld [vmem:[%s1705_s3 + $0x18] sm:$0xff]  ;;  %v31_v11 = vld [vmem:[%s1706_s0 + $0x8] sm:$0xff]  ;;  %v1547_v25 = vand.u32 127, %v267_v24 }
   0x4   :  { %1208 = vmatprep.mubr.msk.f32.mxu0 %vm47_vm0, %v30_v7  ;;  %1320 = vmatprep.subr.bf16.mxu0 %v1319_v5  ;;  %v1523_v12 = vpack.c.bf16 %v188_v10, %v187_v9  ;;  %v1544_v14 = vld [vmem:[%s1707_s2] ss:$0 sm:$0xff]  ;;  %s1450_s2 = smov 32   ;;  %v32_v55 = vld [vmem:[%s1706_s0 + $0x10] sm:$0xff]  ;;  %v33_v56 = vld [vmem:[%s1706_s0 + $0x18] sm:$0xff] }
   0x5   :  { %1325 = vmatpush3.bf16.msra.mxu1 %v1510_v8  ;;  %1322 = vmatpush3.bf16.msra.mxu0 %v1319_v5  ;;  %vm269_vm3 = vcmp.lt.s32.totalorder %v1547_v25, 96  ;;  %v34_v57 = vld [vmem:[%s1706_s0 + $0x20] sm:$0xff]  ;;  %v35_v58 = vld [vmem:[%s1706_s0 + $0x28] sm:$0xff]  ;;  %v36_v59 = vld [vmem:[%s1706_s0 + $0x30] sm:$0xff] }
   0x6   :  { %1326 = vmatprep.subr.bf16.mxu1 %v1447_v0  ;;  %1335 = vmatprep.subr.bf16.mxu0 %v1447_v0  ;;  %v37_v60 = vld [vmem:[%s1706_s0 + $0x38] sm:$0xff]  ;;  %v1035_v25 = vld [vmem:[%s1708_s4 + $0x10] sm:$0xff] }
   0x8   :  { %1209 = vmatmul.mubr.msk.f32.vlgmr.msra.gmra.mrb[0].mxu0 %vm47_vm0, %v31_v11 }
   0x9   :  { %1328 = vmatpush3.bf16.msra.mxu1 %v1523_v12  ;;  %v189_v13 = vld [vmem:[#allocation3] sm:$0xff]  ;;  %1337 = vmatpush3.bf16.msra.mxu0 %v1510_v8  ;;  %v190_v29 = vld [vmem:[#allocation4] sm:$0xff] }
   0xa   :  { %1329 = vmatprep.subr.bf16.mxu1 %v1447_v0  ;;  %1338 = vmatprep.subr.bf16.mxu0 %v1447_v0 }
   0xb   :  { %1211 = vmatprep.mubr.msk.f32.mxu0 %vm47_vm0, %v32_v55 }
   0xc   :  { %1229 = vmatmul.mubr.msk.f32.vlgmr.msra.gmra.mrb[0].mxu1 %vm27_vm2, %v189_v13  ;;  %1212 = vmatmul.mubr.msk.f32.gmra.mrb[2].mxu0 %vm47_vm0, %v33_v56 }
   0xd   :  { %1331 = vmatpush3.bf16.msra.mxu1 %v1510_v8  ;;  %1239 = vmatprep.mubr.msk.f32.mxu1 %vm1448_vm1, %v1449_v4 }
   0xe   :  { %1332 = vmatprep.subr.bf16.mxu1 %v1447_v0  ;;  %1340 = vmatpush3.bf16.msra.mxu0 %v1523_v12 }
   0xf   :  { %1347 = vmatprep.subr.bf16.mxu0 %v1447_v0  ;;  %1214 = vmatprep.mubr.msk.f32.mxu0 %vm47_vm0, %v34_v57 }
  0x10   :  { %1215 = vmatmul.mubr.msk.f32.gmra.mrb[4].mxu0 %vm47_vm0, %v35_v58 }
  0x11   :  { %1334 = vmatpush3.bf16.msra.mxu1 %v1523_v12  ;;  %1217 = vmatprep.mubr.msk.f32.mxu0 %vm47_vm0, %v36_v59 }
  0x12   :  { %1341 = vmatprep.subr.bf16.mxu1 %v1447_v0 }
  0x14   :  { %1218 = vmatmul.mubr.msk.f32.gmra.mrb[6].mxu0 %vm47_vm0, %v37_v60 }
  0x15   :  { %1250 = vmatprep.mubr.msk.f32.mxu0 %vm1448_vm1, %v1449_v4 }
  0xdb   :  { %v1210_v15 = vpop.f32.mrb[0].mxu0 }
  0xdc   :  { %v138_v16 = vpop.f32.mrb[1].mxu0  ;;  %v144_v40 = vadd.f32 %v1210_v15, %v1544_v14 }
  0xdd   :  { %v139_v17 = vadd.f32 %v1544_v14, %v138_v16 }
  0xdf   :  { %v262_v18 = vpop.f32.mrb[0].mxu1  ;;  %v1213_v1 = vpop.f32.mrb[2].mxu0 }
  0xe0   :  { %v266_v19 = vadd.f32 %v262_v18, %v139_v17  ;;  %v1230_v20 = vpop.f32.mrb[1].mxu1  ;;  %v148_v2 = vpop.f32.mrb[3].mxu0 }
  0xe1   :  { %v149_v10 = vadd.f32 %v1544_v14, %v148_v2 }
  0xe2   :  { %v1132_v21 = vmul.f32 -1.442695, %v266_v19 }
  0xe3   :  { %v1597_v3 = vpop.f32.mrb[4].mxu0 }
  0xe4   :  { %1383 = vpow2.f32 %v1132_v21  ;;  %v1599_v5 = vpop.f32.mrb[5].mxu0 }
  0xe5   :  { %1385 = vtanh.f32 %v266_v19 }
  0xe7   :  { %v1601_v6 = vpop.f32.mrb[6].mxu0 }
  0xe8   :  { %v1603_v7 = vpop.f32.mrb[7].mxu0 }
  0xee   :  { %v1384_v22 = vpop.eup %1383 }
  0xef   :  { %v273_v23 = vadd.f32 1.0, %v1384_v22  ;;  %v1386_v26 = vpop.eup %1385 }
  0xf1   :  { %1387 = vrcp.f32 %v273_v23 }
  0xfb   :  { %v1388_v27 = vpop.eup %1387 }
  0xfc   :  { %v277_v28 = vsel %vm269_vm3, %v1388_v27, %v1386_v26 }
  0xfd   :  { %284 = vrot.lane.b32.xlu0 %v277_v28, %s1450_s2 }
 0x101   :  { %279 = vrot.lane.b32.xlu0 %v190_v29, %s1450_s2 }
 0x16f   :  { %v285_v30 = vpop.permute.xlu0 %284 }
 0x170   :  { %v287_v31 = vmul.f32 %v285_v30, %v277_v28 }
 0x172   :  { %289 = vrot.lane.b32.xlu1 %v287_v31, %s1450_s2 }
 0x173   :  { %v280_v32 = vpop.permute.xlu0 %279 }
 0x174   :  { %v282_v33 = vmul.f32 %v280_v32, %v277_v28  ;;  %v154_v32 = vadd.f32 %v1213_v1, %v1544_v14 }
 0x1e4   :  { %v290_v34 = vpop.permute.xlu1 %289 }
 0x1e5   :  { %v292_v35 = vadd.f32 %v290_v34, %v282_v33 }
 0x1e7   :  { %1389 = vtanh.f32 %v292_v35 }
 0x1f1   :  { %v1390_v36 = vpop.eup %1389 }
 0x1f2   :  { %295 = vrot.lane.b32.xlu1 %v1390_v36, %s1450_s2 }
 0x264   :  { %v296_v37 = vpop.permute.xlu1 %295 }
 0x265   :  { %v298_v38 = vmul.f32 %v296_v37, %v277_v28 }
 0x267   :  { %302 = vrot.lane.b32.xlu0 %v298_v38, %s1451_s13 }
 0x2d9   :  { %v303_v39 = vpop.permute.xlu0 %302 }
 0x2da   :  { %1240 = vmatmul.mubr.msk.f32.vlgmr.msra.gmra.mrb[2].mxu1 %vm27_vm2, %v303_v39 }
 0x2db   :  { %1343 = vmatpush3.bf16.msra.mxu1 %v1510_v8  ;;  %1261 = vmatprep.mubr.msk.f32.mxu1 %vm1448_vm1, %v1449_v4 }
 0x2dc   :  { %1344 = vmatprep.subr.bf16.mxu1 %v1447_v0 }
 0x2df   :  { %1346 = vmatpush3.bf16.msra.mxu1 %v1523_v12 }
 0x2e0   :  { %1353 = vmatprep.subr.bf16.mxu1 %v1447_v0 }
 0x3ad   :  { %v372_v41 = vpop.f32.mrb[2].mxu1 }
 0x3ae   :  { %v376_v42 = vadd.f32 %v372_v41, %v144_v40  ;;  %v1241_v43 = vpop.f32.mrb[3].mxu1 }
 0x3b0   :  { %v1134_v44 = vmul.f32 -1.442695, %v376_v42 }
 0x3b2   :  { %1391 = vpow2.f32 %v1134_v44 }
 0x3b3   :  { %1393 = vtanh.f32 %v376_v42 }
 0x3bc   :  { %v1392_v45 = vpop.eup %1391 }
 0x3bd   :  { %v380_v46 = vadd.f32 1.0, %v1392_v45  ;;  %v1394_v47 = vpop.eup %1393 }
 0x3bf   :  { %1395 = vrcp.f32 %v380_v46 }
 0x3c9   :  { %v1396_v48 = vpop.eup %1395 }
 0x3ca   :  { %v384_v49 = vsel %vm269_vm3, %v1396_v48, %v1394_v47 }
 0x3cb   :  { %387 = vrot.lane.b32.xlu1 %v384_v49, %s1450_s2  ;;  %v385_v52 = vmul.f32 %v384_v49, %v292_v35 }
 0x43d   :  { %v388_v50 = vpop.permute.xlu1 %387 }
 0x43e   :  { %v390_v51 = vmul.f32 %v388_v50, %v384_v49 }
 0x440   :  { %392 = vrot.lane.b32.xlu0 %v390_v51, %s1450_s2  ;;  %v159_v51 = vadd.f32 %v1544_v14, %v1599_v5 }
 0x4b2   :  { %v393_v53 = vpop.permute.xlu0 %392 }
 0x4b3   :  { %v395_v54 = vadd.f32 %v393_v53, %v385_v52 }
 0x4b5   :  { %1397 = vtanh.f32 %v395_v54 }
 0x4bf   :  { %v1398_v61 = vpop.eup %1397 }
 0x4c0   :  { %398 = vrot.lane.b32.xlu1 %v1398_v61, %s1450_s2 }
 0x532   :  { %v399_v62 = vpop.permute.xlu1 %398 }
 0x533   :  { %v401_v63 = vmul.f32 %v399_v62, %v384_v49 }
 0x535   :  { %405 = vrot.lane.b32.xlu0 %v401_v63, %s1451_s13 }
 0x5a7   :  { %v406_v9 = vpop.permute.xlu0 %405 }
 0x5a8   :  { %1251 = vmatmul.mubr.msk.f32.vlgmr.msra.gmra.mrb[8].mxu0 %vm27_vm2, %v406_v9 }
 0x5a9   :  { %1349 = vmatpush3.bf16.msra.mxu0 %v1510_v8  ;;  %1272 = vmatprep.mubr.msk.f32.mxu0 %vm1448_vm1, %v1449_v4 }
 0x5aa   :  { %1350 = vmatprep.subr.bf16.mxu0 %v1447_v0 }
 0x5ad   :  { %1352 = vmatpush3.bf16.msra.mxu0 %v1523_v12 }
 0x5ae   :  { %1359 = vmatprep.subr.bf16.mxu0 %v1447_v0 }
 0x67b   :  { %v475_v11 = vpop.f32.mrb[8].mxu0 }
 0x67c   :  { %v479_v13 = vadd.f32 %v475_v11, %v149_v10  ;;  %v1252_v15 = vpop.f32.mrb[9].mxu0 }
 0x67e   :  { %v1136_v16 = vmul.f32 -1.442695, %v479_v13 }
 0x680   :  { %1399 = vpow2.f32 %v1136_v16 }
 0x681   :  { %1401 = vtanh.f32 %v479_v13  ;;  %v164_v13 = vadd.f32 %v1597_v3, %v1544_v14 }
 0x68a   :  { %v1400_v17 = vpop.eup %1399 }
 0x68b   :  { %v483_v18 = vadd.f32 1.0, %v1400_v17  ;;  %v1402_v19 = vpop.eup %1401 }
 0x68d   :  { %1403 = vrcp.f32 %v483_v18 }
 0x697   :  { %v1404_v20 = vpop.eup %1403 }
 0x698   :  { %v487_v21 = vsel %vm269_vm3, %v1404_v20, %v1402_v19 }
 0x699   :  { %490 = vrot.lane.b32.xlu1 %v487_v21, %s1450_s2  ;;  %v488_v24 = vmul.f32 %v487_v21, %v395_v54 }
 0x70b   :  { %v491_v22 = vpop.permute.xlu1 %490 }
 0x70c   :  { %v493_v23 = vmul.f32 %v491_v22, %v487_v21 }
 0x70e   :  { %495 = vrot.lane.b32.xlu0 %v493_v23, %s1450_s2 }
 0x780   :  { %v496_v26 = vpop.permute.xlu0 %495 }
 0x781   :  { %v498_v27 = vadd.f32 %v496_v26, %v488_v24 }
 0x783   :  { %1405 = vtanh.f32 %v498_v27 }
 0x78d   :  { %v1406_v28 = vpop.eup %1405 }
 0x78e   :  { %501 = vrot.lane.b32.xlu1 %v1406_v28, %s1450_s2 }
 0x800   :  { %v502_v29 = vpop.permute.xlu1 %501 }
 0x801   :  { %v504_v30 = vmul.f32 %v502_v29, %v487_v21 }
 0x803   :  { %508 = vrot.lane.b32.xlu0 %v504_v30, %s1451_s13 }
 0x875   :  { %v509_v31 = vpop.permute.xlu0 %508 }
 0x876   :  { %1262 = vmatmul.mubr.msk.f32.vlgmr.msra.gmra.mrb[4].mxu1 %vm27_vm2, %v509_v31  ;;  %v169_v31 = vadd.f32 %v1544_v14, %v1603_v7 }
 0x877   :  { %1355 = vmatpush3.bf16.msra.mxu1 %v1510_v8  ;;  %1283 = vmatprep.mubr.msk.f32.mxu1 %vm1448_vm1, %v1449_v4 }
 0x878   :  { %1356 = vmatprep.subr.bf16.mxu1 %v1447_v0 }
 0x87b   :  { %1358 = vmatpush3.bf16.msra.mxu1 %v1523_v12 }
 0x87c   :  { %1365 = vmatprep.subr.bf16.mxu1 %v1447_v0 }
 0x949   :  { %v578_v33 = vpop.f32.mrb[4].mxu1 }
 0x94a   :  { %v582_v34 = vadd.f32 %v578_v33, %v154_v32  ;;  %v1263_v35 = vpop.f32.mrb[5].mxu1 }
 0x94c   :  { %v1138_v36 = vmul.f32 -1.442695, %v582_v34 }
 0x94e   :  { %1407 = vpow2.f32 %v1138_v36 }
 0x94f   :  { %1409 = vtanh.f32 %v582_v34 }
 0x958   :  { %v1408_v37 = vpop.eup %1407 }
 0x959   :  { %v586_v38 = vadd.f32 1.0, %v1408_v37  ;;  %v1410_v39 = vpop.eup %1409 }
 0x95b   :  { %1411 = vrcp.f32 %v586_v38 }
 0x965   :  { %v1412_v40 = vpop.eup %1411 }
 0x966   :  { %v590_v41 = vsel %vm269_vm3, %v1412_v40, %v1410_v39 }
 0x967   :  { %593 = vrot.lane.b32.xlu1 %v590_v41, %s1450_s2  ;;  %v591_v44 = vmul.f32 %v590_v41, %v498_v27 }
 0x9d9   :  { %v594_v42 = vpop.permute.xlu1 %593 }
 0x9da   :  { %v596_v43 = vmul.f32 %v594_v42, %v590_v41 }
 0x9dc   :  { %598 = vrot.lane.b32.xlu0 %v596_v43, %s1450_s2 }
 0xa4e   :  { %v599_v45 = vpop.permute.xlu0 %598 }
 0xa4f   :  { %v601_v46 = vadd.f32 %v599_v45, %v591_v44 }
 0xa51   :  { %1413 = vtanh.f32 %v601_v46 }
 0xa5b   :  { %v1414_v47 = vpop.eup %1413 }
 0xa5c   :  { %604 = vrot.lane.b32.xlu1 %v1414_v47, %s1450_s2 }
 0xace   :  { %v605_v48 = vpop.permute.xlu1 %604 }
 0xacf   :  { %v607_v49 = vmul.f32 %v605_v48, %v590_v41  ;;  %v174_v48 = vadd.f32 %v1601_v6, %v1544_v14 }
 0xad1   :  { %611 = vrot.lane.b32.xlu0 %v607_v49, %s1451_s13 }
 0xb43   :  { %v612_v50 = vpop.permute.xlu0 %611 }
 0xb44   :  { %1273 = vmatmul.mubr.msk.f32.vlgmr.msra.gmra.mrb[10].mxu0 %vm27_vm2, %v612_v50 }
 0xb45   :  { %1361 = vmatpush3.bf16.msra.mxu0 %v1510_v8  ;;  %1294 = vmatprep.mubr.msk.f32.mxu0 %vm1448_vm1, %v1449_v4 }
 0xb46   :  { %1362 = vmatprep.subr.bf16.mxu0 %v1447_v0 }
 0xb49   :  { %1364 = vmatpush3.bf16.msra.mxu0 %v1523_v12 }
 0xb4a   :  { %1371 = vmatprep.subr.bf16.mxu0 %v1447_v0 }
 0xc17   :  { %v681_v52 = vpop.f32.mrb[10].mxu0 }
 0xc18   :  { %v685_v53 = vadd.f32 %v681_v52, %v159_v51  ;;  %v1274_v54 = vpop.f32.mrb[11].mxu0 }
 0xc1a   :  { %v1140_v55 = vmul.f32 -1.442695, %v685_v53 }
 0xc1c   :  { %1415 = vpow2.f32 %v1140_v55 }
 0xc1d   :  { %1417 = vtanh.f32 %v685_v53 }
 0xc26   :  { %v1416_v56 = vpop.eup %1415 }
 0xc27   :  { %v689_v57 = vadd.f32 1.0, %v1416_v56  ;;  %v1418_v58 = vpop.eup %1417 }
 0xc29   :  { %1419 = vrcp.f32 %v689_v57 }
 0xc33   :  { %v1420_v59 = vpop.eup %1419 }
 0xc34   :  { %v693_v60 = vsel %vm269_vm3, %v1420_v59, %v1418_v58 }
 0xc35   :  { %696 = vrot.lane.b32.xlu1 %v693_v60, %s1450_s2  ;;  %v694_v63 = vmul.f32 %v693_v60, %v601_v46 }
 0xca7   :  { %v697_v61 = vpop.permute.xlu1 %696 }
 0xca8   :  { %v699_v62 = vmul.f32 %v697_v61, %v693_v60  ;;  %v1033_v61 = vld [vmem:[%s1708_s4] sm:$0xff] }
 0xcaa   :  { %701 = vrot.lane.b32.xlu0 %v699_v62, %s1450_s2  ;;  %v1034_v62 = vld [vmem:[%s1708_s4 + $0x8] sm:$0xff] }
 0xd1c   :  { %v702_v1 = vpop.permute.xlu0 %701 }
 0xd1d   :  { %v704_v2 = vadd.f32 %v702_v1, %v694_v63  ;;  %v1372_v63 = vpack.c.bf16 %v1034_v62, %v1033_v61  ;;  %v1036_v1 = vld [vmem:[%s1708_s4 + $0x18] sm:$0xff] }
 0xd1f   :  { %1421 = vtanh.f32 %v704_v2 }
 0xd29   :  { %v1422_v5 = vpop.eup %1421 }
 0xd2a   :  { %707 = vrot.lane.b32.xlu1 %v1422_v5, %s1450_s2 }
 0xd9c   :  { %v708_v9 = vpop.permute.xlu1 %707 }
 0xd9d   :  { %v710_v10 = vmul.f32 %v708_v9, %v693_v60 }
 0xd9f   :  { %714 = vrot.lane.b32.xlu0 %v710_v10, %s1451_s13 }
 0xe11   :  { %v715_v11 = vpop.permute.xlu0 %714 }
 0xe12   :  { %1284 = vmatmul.mubr.msk.f32.vlgmr.msra.gmra.mrb[6].mxu1 %vm27_vm2, %v715_v11 }
 0xe13   :  { %1367 = vmatpush3.bf16.msra.mxu1 %v1510_v8  ;;  %1305 = vmatprep.mubr.msk.f32.mxu1 %vm1448_vm1, %v1449_v4 }
 0xe14   :  { %1368 = vmatprep.subr.bf16.mxu1 %v1447_v0 }
 0xe17   :  { %1370 = vmatpush3.bf16.msra.mxu1 %v1523_v12 }
 0xee5   :  { %v784_v15 = vpop.f32.mrb[6].mxu1 }
 0xee6   :  { %v788_v16 = vadd.f32 %v784_v15, %v164_v13  ;;  %v1285_v17 = vpop.f32.mrb[7].mxu1 }
 0xee8   :  { %v1142_v18 = vmul.f32 -1.442695, %v788_v16 }
 0xeea   :  { %1423 = vpow2.f32 %v1142_v18 }
 0xeeb   :  { %1425 = vtanh.f32 %v788_v16 }
 0xef4   :  { %v1424_v19 = vpop.eup %1423 }
 0xef5   :  { %v792_v20 = vadd.f32 1.0, %v1424_v19  ;;  %v1426_v8 = vpop.eup %1425 }
 0xef7   :  { %1427 = vrcp.f32 %v792_v20 }
 0xf01   :  { %v1428_v21 = vpop.eup %1427 }
 0xf02   :  { %v796_v22 = vsel %vm269_vm3, %v1428_v21, %v1426_v8 }
 0xf03   :  { %799 = vrot.lane.b32.xlu1 %v796_v22, %s1450_s2  ;;  %v797_v3 = vmul.f32 %v796_v22, %v704_v2  ;;  %v1375_v2 = vpack.c.bf16 %v1036_v1, %v1035_v25 }
 0xf75   :  { %v800_v12 = vpop.permute.xlu1 %799 }
 0xf76   :  { %v802_v23 = vmul.f32 %v800_v12, %v796_v22 }
 0xf78   :  { %804 = vrot.lane.b32.xlu0 %v802_v23, %s1450_s2 }
 0xfea   :  { %v805_v24 = vpop.permute.xlu0 %804 }
 0xfeb   :  { %v807_v26 = vadd.f32 %v805_v24, %v797_v3 }
 0xfed   :  { %1429 = vtanh.f32 %v807_v26 }
 0xff7   :  { %v1430_v27 = vpop.eup %1429 }
 0xff8   :  { %810 = vrot.lane.b32.xlu1 %v1430_v27, %s1450_s2 }
0x106a   :  { %v811_v28 = vpop.permute.xlu1 %810 }
0x106b   :  { %v813_v29 = vmul.f32 %v811_v28, %v796_v22 }
0x106d   :  { %817 = vrot.lane.b32.xlu0 %v813_v29, %s1451_s13 }
0x10df   :  { %v818_v30 = vpop.permute.xlu0 %817 }
0x10e0   :  { %1295 = vmatmul.mubr.msk.f32.vlgmr.msra.gmra.mrb[12].mxu0 %vm27_vm2, %v818_v30 }
0x10e1   :  { %1316 = vmatprep.mubr.msk.f32.mxu0 %vm1448_vm1, %v1449_v4  ;;  %1373 = vmatpush3.bf16.msra.mxu0 %v1372_v63 }
0x10e2   :  { %1374 = vmatprep.subr.bf16.mxu0 %v1447_v0  ;;  %v1147_v0 = vld [vmem:[%s1709_s5] ss:$0 sm:$0xff] }
0x10e5   :  { %1376 = vmatpush3.bf16.msra.mxu0 %v1375_v2 }
0x11b3   :  { %v887_v32 = vpop.f32.mrb[12].mxu0 }
0x11b4   :  { %v891_v33 = vadd.f32 %v887_v32, %v169_v31  ;;  %v1296_v34 = vpop.f32.mrb[13].mxu0 }
0x11b6   :  { %v1144_v35 = vmul.f32 -1.442695, %v891_v33 }
0x11b8   :  { %1431 = vpow2.f32 %v1144_v35 }
0x11b9   :  { %1433 = vtanh.f32 %v891_v33 }
0x11c2   :  { %v1432_v36 = vpop.eup %1431 }
0x11c3   :  { %v895_v37 = vadd.f32 1.0, %v1432_v36  ;;  %v1434_v38 = vpop.eup %1433 }
0x11c5   :  { %1435 = vrcp.f32 %v895_v37 }
0x11cf   :  { %v1436_v39 = vpop.eup %1435 }
0x11d0   :  { %v899_v40 = vsel %vm269_vm3, %v1436_v39, %v1434_v38 }
0x11d1   :  { %902 = vrot.lane.b32.xlu1 %v899_v40, %s1450_s2  ;;  %v900_v7 = vmul.f32 %v899_v40, %v807_v26 }
0x1243   :  { %v903_v4 = vpop.permute.xlu1 %902 }
0x1244   :  { %v905_v41 = vmul.f32 %v903_v4, %v899_v40 }
0x1246   :  { %907 = vrot.lane.b32.xlu0 %v905_v41, %s1450_s2 }
0x12b8   :  { %v908_v42 = vpop.permute.xlu0 %907 }
0x12b9   :  { %v910_v43 = vadd.f32 %v908_v42, %v900_v7 }
0x12bb   :  { %1437 = vtanh.f32 %v910_v43 }
0x12c5   :  { %v1438_v44 = vpop.eup %1437 }
0x12c6   :  { %913 = vrot.lane.b32.xlu1 %v1438_v44, %s1450_s2 }
0x1338   :  { %v914_v45 = vpop.permute.xlu1 %913 }
0x1339   :  { %v916_v46 = vmul.f32 %v914_v45, %v899_v40 }
0x133b   :  { %920 = vrot.lane.b32.xlu0 %v916_v46, %s1451_s13 }
0x13ad   :  { %v921_v47 = vpop.permute.xlu0 %920 }
0x13ae   :  { %1306 = vmatmul.mubr.msk.f32.vlgmr.msra.gmra.mrb[8].mxu1 %vm27_vm2, %v921_v47 }
0x1481   :  { %v990_v49 = vpop.f32.mrb[8].mxu1 }
0x1482   :  { %v994_v50 = vadd.f32 %v990_v49, %v174_v48  ;;  %v1307_v51 = vpop.f32.mrb[9].mxu1 }
0x1484   :  { %v1146_v52 = vmul.f32 -1.442695, %v994_v50 }
0x1486   :  { %1439 = vpow2.f32 %v1146_v52 }
0x1487   :  { %1441 = vtanh.f32 %v994_v50 }
0x1490   :  { %v1440_v53 = vpop.eup %1439 }
0x1491   :  { %v998_v54 = vadd.f32 1.0, %v1440_v53  ;;  %v1442_v55 = vpop.eup %1441 }
0x1493   :  { %1443 = vrcp.f32 %v998_v54 }
0x149d   :  { %v1444_v56 = vpop.eup %1443 }
0x149e   :  { %v1002_v57 = vsel %vm269_vm3, %v1444_v56, %v1442_v55 }
0x149f   :  { %1005 = vrot.lane.b32.xlu1 %v1002_v57, %s1450_s2  ;;  %v1003_v14 = vmul.f32 %v1002_v57, %v910_v43 }
0x1511   :  { %v1006_v58 = vpop.permute.xlu1 %1005 }
0x1512   :  { %v1008_v59 = vmul.f32 %v1006_v58, %v1002_v57 }
0x1514   :  { %1010 = vrot.lane.b32.xlu0 %v1008_v59, %s1450_s2 }
0x1586   :  { %v1011_v6 = vpop.permute.xlu0 %1010 }
0x1587   :  { %v1013_v60 = vadd.f32 %v1011_v6, %v1003_v14 }
0x1589   :  { %1445 = vtanh.f32 %v1013_v60 }
0x1593   :  { %v1446_v5 = vpop.eup %1445 }
0x1594   :  { %1016 = vrot.lane.b32.xlu1 %v1446_v5, %s1450_s2 }
0x1598   :  { %1026 = vrot.lane.b32.xlu1 %v1013_v60, %s1452_s8 }
0x1606   :  { %v1017_v9 = vpop.permute.xlu1 %1016 }
0x1607   :  { %v1019_v10 = vmul.f32 %v1017_v9, %v1002_v57 }
0x1609   :  { %1021 = vrot.lane.b32.xlu0 %v1019_v10, %s1451_s13 }
0x160a   :  { %v1027_v11 = vpop.permute.xlu1 %1026 }
0x160b   :  { %1029 = vst.msk [vmem:[#allocation4] sm:$0xff] %vm27_vm2, %v1027_v11 }
0x167b   :  { %v1022_v13 = vpop.permute.xlu0 %1021 }
0x167c   :  { %1024 = vst.msk [vmem:[#allocation3] sm:$0xff] %vm27_vm2, %v1022_v13  ;;  %1317 = vmatmul.mubr.msk.f32.vlgmr.msra.gmra.mrb[14].mxu0 %vm27_vm2, %v1022_v13 }
0x174f   :  { %v1112_v15 = vpop.f32.mrb[14].mxu0 }
0x1750   :  { %v1113_v16 = vadd.f32 %v1147_v0, %v1112_v15  ;;  %v1318_v17 = vpop.f32.mrb[15].mxu0 }
0x1752   :  { %1117 = vst.msk [vmem:[%s1710_s6] sm:$0xff] %vm1116_vm4, %v1113_v16 }

</bundles_post_ra>
